<compile_context>
chip_gen: v6e
topology: v6e:2x2x1
jax: 0.10.0
libtpu: 0.0.40
codegen_flags: <defaults>
</compile_context>

<pallas_src>
import jax
import jax.numpy as jnp
from jax.experimental import pallas as pl
from jax.experimental.pallas import tpu as pltpu


def _ln2d_kernel(eps, inv_c):
    def kernel(x_ref, w_ref, b_ref, o_ref):
        # x_ref: (1, C, TILE) -- channels on sublanes, pixels on lanes.
        x = x_ref[...].astype(jnp.float32)
        # Single-pass moments: the two cross-sublane reductions are
        # independent and overlap in the XLU.
        s1 = jnp.sum(x, axis=1, keepdims=True)            # (1, 1, TILE)
        s2 = jnp.sum(x * x, axis=1, keepdims=True)        # (1, 1, TILE)
        mu = s1 * inv_c
        var = jnp.maximum(s2 * inv_c - mu * mu, 0.0)      # biased variance
        y = (x - mu) * jax.lax.rsqrt(var + eps)           # rsqrt -> EUP slot
        w = w_ref[...].astype(jnp.float32)                # (1, C, 1)
        b = b_ref[...].astype(jnp.float32)                # (1, C, 1)
        o_ref[...] = (w * y + b).astype(o_ref.dtype)
    return kernel


def _pick_lane_tile(hw, n, c, itemsize, max_tile, vmem_block_budget):
    """Lane tile: multiple of 128 (or the full width when H*W < 128), sized so
    the double-buffered in + out blocks (input dtype) fit the block budget."""
    if hw <= 128:
        return hw                                    # single full-width block
    per_lane_bytes = 4 * c * itemsize                # 2 in + 2 out buffers
    cap = max(128, (vmem_block_budget // per_lane_bytes) // 128 * 128)
    cap = min(cap, max_tile)
    tile = min(cap, (hw // 128) * 128)
    # v7x: keep at least 2 grid programs so both TensorCores are used.
    if n == 1 and hw >= 256 and pl.cdiv(hw, tile) < 2:
        tile = max(128, ((hw // 2) // 128) * 128)
    return tile


def layer_norm_2d(x, weight, bias, eps=1e-6, max_lane_tile=8192,
                  vmem_block_budget=8 << 20):
    """x: (N, C, H, W); weight, bias: (C,). Returns (N, C, H, W)."""
    N, C, H, W = x.shape
    hw = H * W

    # Free reshape (contiguous), no transpose, no padding: (N, C, H*W).
    # C -> sublanes (cheap cross-sublane reduce), H*W -> lanes (dense stores).
    x3 = x.reshape(N, C, hw)
    w3 = weight.reshape(1, C, 1)
    b3 = bias.reshape(1, C, 1)

    itemsize = jnp.dtype(x.dtype).itemsize
    tile = _pick_lane_tile(hw, N, C, itemsize, max_lane_tile, vmem_block_budget)

    grid = (N, pl.cdiv(hw, tile))  # ragged edge block handled by Pallas

    out = pl.pallas_call(
        _ln2d_kernel(eps, 1.0 / C),
        out_shape=jax.ShapeDtypeStruct((N, C, hw), x.dtype),
        grid_spec=pltpu.PrefetchScalarGridSpec(
            num_scalar_prefetch=0,
            grid=grid,
            in_specs=[
                pl.BlockSpec((1, C, tile), lambda n, i: (n, 0, i)),
                pl.BlockSpec((1, C, 1), lambda n, i: (0, 0, 0)),
                pl.BlockSpec((1, C, 1), lambda n, i: (0, 0, 0)),
            ],
            out_specs=pl.BlockSpec((1, C, tile), lambda n, i: (n, 0, i)),
        ),
        compiler_params=pltpu.CompilerParams(
            dimension_semantics=("parallel", "parallel"),
        ),
    )(x3, w3, b3)

    return out.reshape(N, C, H, W)


def _reference_ln2d(x, weight, bias, eps=1e-6):
    mu = jnp.mean(x, axis=1, keepdims=True)
    var = jnp.mean((x - mu) ** 2, axis=1, keepdims=True)
    y = (x - mu) / jnp.sqrt(var + eps)
    return weight.reshape(1, -1, 1, 1) * y + bias.reshape(1, -1, 1, 1)


# TODO(synk): only the forward pass is implemented; the custom autograd
# backward in LayerNormFunction.backward is not ported.

if __name__ == "__main__":
    key = jax.random.PRNGKey(0)

    # Primary shape: batch=2, channels=4, spatial=16 (H*W multiple of 128).
    N, C, H, W = 2, 4, 16, 16
    kx, kw, kb = jax.random.split(key, 3)
    x = jax.random.normal(kx, (N, C, H, W), dtype=jnp.float32)
    # nn.Parameter(torch.ones/zeros(channels)), perturbed so affine is exercised
    weight = jnp.ones((C,), jnp.float32) + 0.1 * jax.random.normal(kw, (C,))
    bias = jnp.zeros((C,), jnp.float32) + 0.1 * jax.random.normal(kb, (C,))

    out = jax.block_until_ready(layer_norm_2d(x, weight, bias, eps=1e-6))
    ref = _reference_ln2d(x, weight, bias, eps=1e-6)
    assert out.shape == (N, C, H, W)
    assert jnp.allclose(out, ref, atol=1e-5, rtol=1e-5), "mismatch vs reference"

    # Ragged-edge check: H*W not a multiple of 128, N == 1 (masked writeback
    # of the edge block; grid still has >= 2 programs for v7x).
    N2, C2, H2, W2 = 1, 4, 12, 12   # hw = 144
    x2 = jax.random.normal(jax.random.PRNGKey(1), (N2, C2, H2, W2), jnp.float32)
    w2 = jnp.ones((C2,), jnp.float32)
    b2 = jnp.zeros((C2,), jnp.float32)
    out2 = jax.block_until_ready(layer_norm_2d(x2, w2, b2, eps=1e-6))
    ref2 = _reference_ln2d(x2, w2, b2, eps=1e-6)
    assert out2.shape == (N2, C2, H2, W2)
    assert jnp.allclose(out2, ref2, atol=1e-5, rtol=1e-5), "ragged-edge mismatch"

    print("KERNEL_OK")
</pallas_src>

<mosaic_0001>
module attributes {stable_mosaic.version = 11 : i64} {
  func.func @kernel(%arg0: i32, %arg1: i32, %arg2: memref<1x4x256xf32, #tpu.memory_space<vmem>>, %arg3: memref<1x4x1xf32, #tpu.memory_space<vmem>>, %arg4: memref<1x4x1xf32, #tpu.memory_space<vmem>>, %arg5: memref<1x4x256xf32, #tpu.memory_space<vmem>>) attributes {dimension_semantics = [#tpu.dimension_semantics<parallel>, #tpu.dimension_semantics<parallel>], iteration_bounds = array<i64: 2, 1>, scalar_prefetch = 0 : i64, scratch_operands = 0 : i64, tpu.core_type = #tpu.core_type<tc>, window_params = [{transform_indices = @transform_0, window_bounds = array<i64: 1, 4, 256>}, {pipeline_mode = #tpu.pipeline_mode<synchronous>, transform_indices = @transform_1, window_bounds = array<i64: 1, 4, 1>}, {pipeline_mode = #tpu.pipeline_mode<synchronous>, transform_indices = @transform_2, window_bounds = array<i64: 1, 4, 1>}, {transform_indices = @transform_3, window_bounds = array<i64: 1, 4, 256>}]} {
    %c0 = arith.constant 0 : index
    %c0_0 = arith.constant 0 : index
    %c0_1 = arith.constant 0 : index
    %0 = vector.load %arg2[%c0, %c0_0, %c0_1] : memref<1x4x256xf32, #tpu.memory_space<vmem>>, vector<1x4x256xf32>
    %cst = arith.constant dense<0.000000e+00> : vector<1x256xf32>
    %1 = vector.multi_reduction <add>, %0, %cst [1] : vector<1x4x256xf32> to vector<1x256xf32>
    %2 = vector.shape_cast %1 : vector<1x256xf32> to vector<1x1x256xf32>
    %3 = arith.mulf %0, %0 : vector<1x4x256xf32>
    %cst_2 = arith.constant dense<0.000000e+00> : vector<1x256xf32>
    %4 = vector.multi_reduction <add>, %3, %cst_2 [1] : vector<1x4x256xf32> to vector<1x256xf32>
    %5 = vector.shape_cast %4 : vector<1x256xf32> to vector<1x1x256xf32>
    %cst_3 = arith.constant 2.500000e-01 : f32
    %6 = vector.broadcast %cst_3 : f32 to vector<1x1x256xf32>
    %7 = arith.mulf %2, %6 : vector<1x1x256xf32>
    %cst_4 = arith.constant 2.500000e-01 : f32
    %8 = vector.broadcast %cst_4 : f32 to vector<1x1x256xf32>
    %9 = arith.mulf %5, %8 : vector<1x1x256xf32>
    %10 = arith.mulf %7, %7 : vector<1x1x256xf32>
    %11 = arith.subf %9, %10 : vector<1x1x256xf32>
    %cst_5 = arith.constant 0.000000e+00 : f32
    %12 = vector.broadcast %cst_5 : f32 to vector<1x1x256xf32>
    %13 = arith.maximumf %11, %12 : vector<1x1x256xf32>
    %14 = vector.broadcast %7 : vector<1x1x256xf32> to vector<1x4x256xf32>
    %15 = arith.subf %0, %14 : vector<1x4x256xf32>
    %cst_6 = arith.constant 9.99999997E-7 : f32
    %16 = vector.broadcast %cst_6 : f32 to vector<1x1x256xf32>
    %17 = arith.addf %13, %16 : vector<1x1x256xf32>
    %18 = math.rsqrt %17 : vector<1x1x256xf32>
    %19 = vector.broadcast %18 : vector<1x1x256xf32> to vector<1x4x256xf32>
    %20 = arith.mulf %15, %19 : vector<1x4x256xf32>
    %c0_7 = arith.constant 0 : index
    %c0_8 = arith.constant 0 : index
    %c0_9 = arith.constant 0 : index
    %21 = vector.load %arg3[%c0_7, %c0_8, %c0_9] : memref<1x4x1xf32, #tpu.memory_space<vmem>>, vector<1x4x1xf32>
    %c0_10 = arith.constant 0 : index
    %c0_11 = arith.constant 0 : index
    %c0_12 = arith.constant 0 : index
    %22 = vector.load %arg4[%c0_10, %c0_11, %c0_12] : memref<1x4x1xf32, #tpu.memory_space<vmem>>, vector<1x4x1xf32>
    %23 = vector.broadcast %21 : vector<1x4x1xf32> to vector<1x4x256xf32>
    %24 = arith.mulf %23, %20 : vector<1x4x256xf32>
    %25 = vector.broadcast %22 : vector<1x4x1xf32> to vector<1x4x256xf32>
    %26 = arith.addf %24, %25 : vector<1x4x256xf32>
    %c0_13 = arith.constant 0 : index
    %c0_14 = arith.constant 0 : index
    %c0_15 = arith.constant 0 : index
    %27 = vector.load %arg5[%c0_13, %c0_14, %c0_15] : memref<1x4x256xf32, #tpu.memory_space<vmem>>, vector<1x4x256xf32>
    tpu.vector_store %arg5[%c0_13, %c0_14, %c0_15], %26 {strides = array<i32>} : memref<1x4x256xf32, #tpu.memory_space<vmem>>, vector<1x4x256xf32>,
    return
  }
  func.func @transform_0(%arg0: i32, %arg1: i32) -> (i32, i32, i32) {
    %c0_i32 = arith.constant 0 : i32
    %c0_i32_0 = arith.constant 0 : i32
    return %arg0, %c0_i32, %arg1 : i32, i32, i32
  }
  func.func @transform_1(%arg0: i32, %arg1: i32) -> (i32, i32, i32) {
    %c0_i32 = arith.constant 0 : i32
    %c0_i32_0 = arith.constant 0 : i32
    %c0_i32_1 = arith.constant 0 : i32
    %c0_i32_2 = arith.constant 0 : i32
    return %c0_i32, %c0_i32_0, %c0_i32_1 : i32, i32, i32
  }
  func.func @transform_2(%arg0: i32, %arg1: i32) -> (i32, i32, i32) {
    %c0_i32 = arith.constant 0 : i32
    %c0_i32_0 = arith.constant 0 : i32
    %c0_i32_1 = arith.constant 0 : i32
    %c0_i32_2 = arith.constant 0 : i32
    return %c0_i32, %c0_i32_0, %c0_i32_1 : i32, i32, i32
  }
  func.func @transform_3(%arg0: i32, %arg1: i32) -> (i32, i32, i32) {
    %c0_i32 = arith.constant 0 : i32
    %c0_i32_0 = arith.constant 0 : i32
    return %arg0, %c0_i32, %arg1 : i32, i32, i32
  }
}

</mosaic_0001>

<bundles_post_ra>
// kernel: tpu_custom_call.1
= control target key start
LH: loop header
LB: loop body
LE: loop exit
PB: predicated region body
PF: predicated region fallthrough
CT: control target
= control target key end

     0   :  { %8 = vsyncpa [#allocation3], 0  ;;  %s756_s0 = inlined_call_operand.hbm [shape: f32[2,4,256], index: 0, kind: input, shape index: {}]   ;;  %s757_s1 = inlined_call_operand.vmem [shape: f32[1,4,1], index: 1, kind: input, shape index: {}]   ;;  %s758_s2 = inlined_call_operand.vmem [shape: f32[1,4,1], index: 2, kind: input, shape index: {}]   ;;  %s759_s3 = inlined_call_operand.hbm [shape: f32[2,4,256], index: 3, kind: output, shape index: {}]  }
   0x1   :  { %10 = vsyncpa [#allocation3 + $0x1], 0 }
   0x2   :  { %11 = vsyncpa [#allocation4], 0 }
   0x3   :  { %13 = vsyncpa [#allocation4 + $0x1], 0  ;;  %s612_s12 = smov 0   ;;  %s614_s13 = smov 0  }
   0x4   :  { %s616_s14 = smov 0   ;;  %s618_s15 = smov 0  }
   0x5   :  { %s620_s16 = smov 0   ;;  %s622_s17 = smov 0  }
   0x6 LB: > { %s393_s18 = sadd.s32 4294967295, %s587_s17   ;;  %s394_s19 = sadd.s32 4294967294, %s587_s17   ;;  %s587_s17 = sphi %s622_s17, %s19_s17   ;;  %s583_s16 = sphi %s620_s16, %s771_s16   ;;  %s579_s15 = sphi %s618_s15, %s770_s15   ;;  %s575_s14 = sphi %s616_s14, %s769_s14   ;;  %s571_s13 = sphi %s614_s13, %s768_s13   ;;  %s567_s12 = sphi %s612_s12, %s767_s12  }
   0x7   : > { %s31_s20 = sadd.s32 1, %s583_s16  ;;  %s40_s21 = sadd.s32 1, %s575_s14 }
   0x8   : > { %p33_p0 = scmp.ge.s32.totalorder %s31_s20, 2  ;;  %p47_p1 = scmp.ne.s32.totalorder %s575_s14, %s571_s13 }
   0x9   : > { %p48_p2 = scmp.eq.s32.totalorder %s587_s17, 0  ;;  %p53_p3 = scmp.ne.s32.totalorder %s571_s13, %s567_s12 }
   0xa   : > { %s773_s20 = smov (%p33_p0, %s31_s20), 0  ;;  %p54_p5 = scmp.eq.s32.totalorder %s393_s18, 0 }
   0xb   : > { %p653_p4 = por %p48_p2, %p47_p1  ;;  %s35_s23 = ssub.s32 %s583_s16, %s773_s20 }
   0xc   : > { %p121_p6 = scmp.eq.s32.totalorder %s393_s18, 1  ;;  %p38_p7 = scmp.eq.s32.totalorder %s35_s23, 0 }
   0xd   : > { %p659_p8 = por %p54_p5, %p53_p3  ;;  %p127_p10 = scmp.eq.s32.totalorder %s394_s19, 1 }
   0xe   : > { %p663_p9 = por %p121_p6, %p47_p1  ;;  %p422_p13 = scmp.lt.s32.totalorder %s587_s17, 2 }
   0xf   : > { %s668_s26 = scalar_select %p38_p7, %s575_s14, %s40_s21  }
  0x10   : > { %p670_p11 = por %p127_p10, %p53_p3  ;;  %s153_s28 = sand.u32 1, %s575_s14  }
  0x11   : > { %s397_s29 = sshll.u32 %s153_s28, 3  ;;  %s408_s30 = sshll.u32 %s583_s16, 7 }
  0x12   : > { %s763_s27 = scalar_select %p670_p11, 1, 0 }
  0x13   : > { %s165_s6 = scalar_lea.hbm %s756_s0, %s408_s30  ;;  %s157_s7 = scalar_lea.vmem [#allocation2], %s397_s29 }
  0x14   : > { %s167_s8 = sshll.u32 %s157_s7, 4  ;;  %p683_p0 = pnand %p422_p13, %p653_p4  ;;  %s168_s8 = int_to_ptr.vmem [resolvable:$true] %s167_s8 }
  0x15   : > { %p400_p1 = scmp.ge.s32.totalorder %s587_s17, 1  ;;  %p172_p2 = scmp.lt.s32.totalorder %s587_s17, 3 }
  0x16   : > { %s154_s10 = scalar_lea.sflag [#allocation3], %s153_s28  ;;  %p481_p3 = pneg %p683_p0 }
  0x17   : > { %s492_s11 = scalar_lea.vmem %s168_s8, 128  ;;  %s589_s18 = smov [#allocation2]  }
  0x18   : > { %p493_p5 = scmp.ne.s32.totalorder %s168_s8, %s492_s11  ;;  %s497_s19 = sshll.u32 %s589_s18, 4  ;;  %s498_s19 = int_to_ptr.vmem [resolvable:$false] %s497_s19 }
  0x19   : > { %s499_s21 = scalar_lea.vmem %s498_s19, 256  ;;  %p500_p10 = scmp.lt.s32.totalorder %s168_s8, %s498_s19 }
  0x1a   : > { %p495_p6 = pnand %p493_p5, %p481_p3  ;;  %p501_p12 = scmp.lt.s32.totalorder %s499_s21, %s492_s11 }
  0x1c   : > { %p496_p7 = pneg %p495_p6  ;;  %p502_p4 = por %p501_p12, %p500_p10 }
  0x1e   : > { %p503_p13 = pnand %p502_p4, %p496_p7 }
  0x20   : > { %506 = shalt.err (!%p503_p13)
}
  0x21   : > { %417 = dma.hbm_to_vmem [thread:$0]  (!%p683_p0), %s165_s6, 128, %s168_s8, %s154_s10  }
  0x22   : > { %p173_p11 = pnand %p400_p1, %p172_p2 }
  0x23   : > { %s698_s22 = sand.u32 (!%p173_p11), 1, %s571_s13  }
  0x24   : > { %176 = sbr.rel (%p173_p11) target bundleno = 189 (0xbd), region = 32  ;;  %s401_s23 = sshll.u32 (!%p173_p11), %s698_s22, 3 }
  0x25   : > { %s179_s28 = scalar_lea.sflag (!%p173_p11), [#allocation3], %s698_s22  ;;  %s182_s29 = scalar_lea.vmem (!%p173_p11), [#allocation2], %s401_s23 }
  0x29   : > { %558 = dma.done.wait (%p659_p8), %s179_s28, 128  }
  0x2a   : > { %560 = vsyncadd (%p659_p8), %s179_s28, 4294967168  ;;  %v590_v0 = vmov 0   ;;  %v268_v1 = vld [vmem:[%s757_s1] sm:$0xf]  ;;  %vm211_vm0 = vcmask 1043456   ;;  %s409_s24 = sshll.u32 %s579_s15, 7 }
  0x2b   : > { %473 = vset.pattern.permute.xlu0 %v590_v0  ;;  %v269_v2 = vld [vmem:[%s758_s2] sm:$0xf]  ;;  %s204_s7 = scalar_lea.vmem [#allocation5], %s401_s23  ;;  %s307_s11 = scalar_lea.hbm %s759_s3, %s409_s24 }
  0x2c   : > { %272 = vperm.xlu0 %473, %v268_v1   ;;  %v207_v3 = vld [vmem:[%s182_s29] sm:$0xff]  ;;  %s309_s8 = sshll.u32 %s204_s7, 4  ;;  %s293_s18 = scalar_lea.sflag [#allocation4], %s698_s22  ;;  %s310_s8 = int_to_ptr.vmem [resolvable:$true] %s309_s8 }
  0x2d   : > { %v209_v4 = vcombine.high %v207_v3, %v207_v3  ;;  %v226_v5 = vmul.f32 %v207_v3, %v207_v3  ;;  %v212_v6 = vsel %vm211_vm0, %v207_v3, 0.0  ;;  %s507_s19 = scalar_lea.vmem %s310_s8, 128  ;;  %s591_s21 = smov [#allocation5]  }
  0x2e   : > { %v213_v9 = vrot.slane %v212_v6, 4  ;;  %p508_p8 = scmp.ne.s32.totalorder %s310_s8, %s507_s19  ;;  %s511_s15 = sshll.u32 %s591_s21, 4  ;;  %s512_s15 = int_to_ptr.vmem [resolvable:$false] %s511_s15 }
  0x2f   : > { %v219_v7 = vsel %vm211_vm0, %v209_v4, 0.0  ;;  %v228_v8 = vcombine.high %v226_v5, %v226_v5  ;;  %v230_v11 = vsel %vm211_vm0, %v226_v5, 0.0  ;;  %s513_s23 = scalar_lea.vmem %s512_s15, 256  ;;  %p514_p0 = scmp.lt.s32.totalorder %s310_s8, %s512_s15 }
  0x30   : > { %282 = vperm.xlu0 %473, %v269_v2   ;;  %v220_v10 = vrot.slane %v219_v7, 4  ;;  %v214_v13 = vadd.f32 %v213_v9, %v212_v6  ;;  %v231_v14 = vrot.slane %v230_v11, 4  ;;  %p509_p11 = pnand %p508_p8, %p663_p9  ;;  %p515_p1 = scmp.lt.s32.totalorder %s513_s23, %s507_s19 }
  0x31   : > { %v237_v12 = vsel %vm211_vm0, %v228_v8, 0.0 }
  0x32   : > { %v221_v15 = vadd.f32 %v220_v10, %v219_v7  ;;  %v238_v16 = vrot.slane %v237_v12, 4  ;;  %v215_v17 = vrot.slane %v214_v13, 2  ;;  %v232_v18 = vadd.f32 %v231_v14, %v230_v11  ;;  %p510_p12 = pneg %p509_p11  ;;  %p516_p2 = por %p515_p1, %p514_p0 }
  0x34   : > { %v222_v19 = vrot.slane %v221_v15, 2  ;;  %v239_v20 = vadd.f32 %v238_v16, %v237_v12  ;;  %v216_v21 = vadd.f32 %v215_v17, %v214_v13  ;;  %v233_v22 = vrot.slane %v232_v18, 2  ;;  %p517_p3 = pnand %p516_p2, %p510_p12 }
  0x36   : > { %v223_v23 = vadd.f32 %v222_v19, %v221_v15  ;;  %v240_v24 = vrot.slane %v239_v20, 2  ;;  %v217_v25 = vrot.slane %v216_v21, 1  ;;  %v234_v26 = vadd.f32 %v233_v22, %v232_v18 }
  0x38   : > { %v224_v27 = vrot.slane %v223_v23, 1  ;;  %v241_v28 = vadd.f32 %v240_v24, %v239_v20  ;;  %v218_v29 = vadd.f32 %v217_v25, %v216_v21  ;;  %v235_v30 = vrot.slane %v234_v26, 1 }
  0x3a   : > { %v225_v31 = vadd.f32 %v224_v27, %v223_v23  ;;  %v242_v32 = vrot.slane %v241_v28, 1  ;;  %v236_v33 = vadd.f32 %v235_v30, %v234_v26  ;;  %v244_v34 = vmul.f32 0.25, %v218_v29 }
  0x3c   : > { %v243_v35 = vadd.f32 %v242_v32, %v241_v28  ;;  %v245_v36 = vmul.f32 0.25, %v225_v31  ;;  %v246_v37 = vmul.f32 0.25, %v236_v33  ;;  %v248_v38 = vmul.f32 %v244_v34, %v244_v34 }
  0x3e   : > { %v247_v39 = vmul.f32 0.25, %v243_v35  ;;  %v249_v40 = vmul.f32 %v245_v36, %v245_v36  ;;  %v250_v41 = vsub.f32 %v246_v37, %v248_v38  ;;  %v256_v48 = vcombine.low %v244_v34, %v245_v36 }
  0x40   : > { %v251_v42 = vsub.f32 %v247_v39, %v249_v40  ;;  %v252_v43 = vmax.f32 %v250_v41, 0.0  ;;  %v258_v50 = vsub.f32 %v207_v3, %v256_v48 }
  0x42   : > { %v253_v44 = vmax.f32 %v251_v42, 0.0  ;;  %v259_v45 = vadd.f32 1e-06, %v252_v43 }
  0x44   : > { %v260_v46 = vadd.f32 1e-06, %v253_v44  ;;  %475 = vrsqrt.f32 %v259_v45 }
  0x46   : > { %477 = vrsqrt.f32 %v260_v46 }
  0x51   : > { %v476_v47 = vpop.eup %475 }
  0x53   : > { %v478_v49 = vpop.eup %477 }
  0x54   : > { %v265_v51 = vcombine.low %v476_v47, %v478_v49 }
  0x56   : > { %v267_v52 = vmul.f32 %v265_v51, %v258_v50 }
  0x58   : > { %v276_v53 = vcombine.high %v267_v52, %v267_v52 }
  0xa7   : > { %v273_v54 = vpop.permute.xlu0 %272 }
  0xa8   : > { %v278_v55 = vmul.f32 %v273_v54, %v267_v52  ;;  %v279_v56 = vmul.f32 %v276_v53, %v273_v54 }
  0xab   : > { %v283_v57 = vpop.permute.xlu0 %282 }
  0xac   : > { %v285_v58 = vadd.f32 %v283_v57, %v278_v55  ;;  %v286_v59 = vadd.f32 %v283_v57, %v279_v56 }
  0xae   : > { %v289_v60 = vcombine.low %v285_v58, %v286_v59 }
  0xb0   : > { %291 = vst [vmem:[%s204_s7] sm:$0xff] %v289_v60 }
  0xb1   : > { %520 = shalt.err (!%p517_p3)
}
  0xb2   : > { %s521_s28 = scalar_lea.hbm %s307_s11, 128  ;;  %s525_s30 = scalar_lea.hbm %s759_s3, 256 }
  0xb3   : > { %p522_p5 = scmp.ne.s32.totalorder %s307_s11, %s521_s28  ;;  %p526_p10 = scmp.lt.s32.totalorder %s307_s11, %s759_s3 }
  0xb4   : > { %p527_p4 = scmp.lt.s32.totalorder %s525_s30, %s521_s28 }
  0xb5   : > { %p523_p6 = pnand %p522_p5, %p663_p9 }
  0xb6   : > { %p528_p13 = por %p527_p4, %p526_p10 }
  0xb7   : > { %p524_p7 = pneg %p523_p6 }
  0xb9   : > { %p529_p8 = pnand %p528_p13, %p524_p7 }
  0xbb   : > { %532 = shalt.err (!%p529_p8)
}
  0xbc   : > { %412 = dma.vmem_to_hbm [thread:$0]  (%p663_p9), %s310_s8, 128, %s307_s11, %s293_s18  }
  0xbd PF: > { %s321_s6 = sand.u32 1, %s567_s12   ;;  %p765_p11 = scmp.ne.s32.totalorder %s763_s27, 0 }
  0xbe   : > { %p766_p12 = scmp.ge.s32.totalorder %s587_s17, 2  ;;  %s322_s24 = scalar_lea.sflag [#allocation4], %s321_s6 }
  0xc0   : > { %p419_p0 = pnand %p766_p12, %p765_p11 }
  0xc2   : > { %p420_p1 = pneg %p419_p0 }
  0xc4   : > { %562 = dma.done.wait (%p420_p1), %s322_s24, 128  }
  0xc5   : > { %564 = vsyncadd (%p420_p1), %s322_s24, 4294967168  ;;  %s19_s17 = sadd.s32 1, %s587_s17   ;;  %s767_s12 = smov %s571_s13 }
  0xc6   : > { %p16_p2 = scmp.ge.s32.totalorder %s19_s17, 4   ;;  %s768_s13 = smov %s575_s14 }
  0xc7   : > { %s769_s14 = smov %s668_s26  ;;  %s770_s15 = smov %s583_s16 }
  0xc8   : > { %s771_s16 = smov %s773_s20  ;;  %18 = sbr.rel (!%p16_p2) target bundleno = 6 (0x6), region = 77 }
  0xcd   :  { %327 = vsyncpa [#allocation3], 1 }
  0xce   :  { %329 = vsyncpa [#allocation3 + $0x1], 1 }
  0xcf   :  { %330 = vsyncpa [#allocation4], 1 }
  0xd0   :  { %332 = vsyncpa [#allocation4 + $0x1], 1 }

</bundles_post_ra>
